<compile_context>
chip_gen: v7x
topology: tpu7x:2x2x1
jax: 0.10.0
libtpu: 0.0.40
codegen_flags: <defaults>
</compile_context>

<pallas_src>
import functools

import jax
import jax.numpy as jnp
import numpy as np
from jax.experimental import pallas as pl
from jax.experimental.pallas import tpu as pltpu

_LANE = 128
_MIB = 1024 * 1024


def _norm_kernel(x_ref, a_ref, b_ref, o_ref, *, eps):
    """One (N, TILE_H) block: full batch, one lane slice of hidden.

    Single-pass moments over dim=0; the mean is folded into the affine shift
    so no (N, TILE_H) `centered` temporary is materialized and the
    per-element path is a single mul-add.
    """
    x = x_ref[...].astype(jnp.float32)                       # (N, TH)
    n = x.shape[0]

    s = jnp.sum(x, axis=0, keepdims=True)                    # (1, TH)
    ss = jnp.sum(x * x, axis=0, keepdims=True)                # (1, TH)
    mean = s * (1.0 / n)                                      # (1, TH)
    # Unbiased (ddof=1) variance; guard tiny negative cancellation residue.
    var = jnp.maximum((ss - s * mean) / (n - 1), 0.0)
    std = jnp.sqrt(var)                                       # (1, TH)

    # Divides only on the (1, TH) row; fold gain and mean into scale/shift.
    inv = pl.reciprocal(std + eps, approx=False)              # exact semantics
    scale = a_ref[...].astype(jnp.float32) * inv              # a / (std + eps)
    shift = b_ref[...].astype(jnp.float32) - mean * scale     # b - mean*scale

    o_ref[...] = (x * scale + shift).astype(o_ref.dtype)


def _vmem_capacity_bytes():
    """Physical VMEM per core (chip-aware), with a conservative fallback."""
    try:
        info = pltpu.get_tpu_info()
        cap = int(getattr(info, "vmem_capacity_bytes", 0))
        if cap > 0:
            return cap
    except Exception:
        pass
    return 64 * _MIB  # v7x per-TC size: safe lower bound for all generations


def _choose_tile_h(n_rows, h, itemsize):
    """Largest useful lane-dense hidden tile, sized by bytes and VMEM budget."""
    phys = _vmem_capacity_bytes()
    budget = int(0.6 * phys)          # scoped-VMEM working budget for this kernel
    # Per-step x-block byte target: >=4 MiB amortizes the ~0.35us grid-step
    # overhead on high-bandwidth parts (v7x) and also satisfies the >=2 MiB
    # guidance for v5e/v6e.
    target_block = 4 * _MIB

    def vmem_need(th):
        io = 2 * 2 * n_rows * th * itemsize        # double-buffered x + out blocks
        params = 2 * 2 * 1 * th * itemsize          # double-buffered a + b rows
        f32_tmp = 2 * n_rows * th * 4               # in-kernel f32 working set
        return io + params + f32_tmp

    # Guard: even the minimum (N, 128) block must fit (hits first on v7x 64 MiB).
    if vmem_need(min(h, _LANE)) > budget:
        # TODO(synk): add an N-tiled ("arbitrary") reduction path with scratch
        # sum/sumsq accumulators + pl.when finalize for very large batches.
        raise ValueError(
            f"batch={n_rows} too large for a full-N column block in VMEM "
            f"(need {vmem_need(min(h, _LANE))} B > budget {budget} B)")

    tile_from_target = max(
        _LANE, (target_block // max(1, n_rows * itemsize)) // _LANE * _LANE)

    if h <= tile_from_target and vmem_need(h) <= budget:
        tile_h = h                                  # single full-H block (legal:
                                                    # block dim == array dim)
    else:
        tile_h = min(tile_from_target, max(_LANE, (h // _LANE) * _LANE))
        while tile_h > _LANE and vmem_need(tile_h) > budget:
            tile_h -= _LANE

    # For large H, ensure >= 2 grid steps so the "parallel" H axis can be
    # sharded across both TensorCores on v7x (no-op on single-TC v5e/v6e).
    if h >= 8 * _LANE and -(-h // tile_h) == 1:
        tile_h = ((-(-h // 2) + _LANE - 1) // _LANE) * _LANE

    return tile_h, vmem_need(tile_h)


def norm_forward(x, a, b, eps=1e-8):
    """Pallas equivalent of Norm(n_hidden, eps, dim=0).forward(x).

    x: (N, H) float array; a, b: (1, H) parameters. Requires N >= 2
    (unbiased std divides by N - 1, as torch does).
    """
    N, H = x.shape
    assert N >= 2, "unbiased std (ddof=1) requires at least 2 rows"
    itemsize = jnp.dtype(x.dtype).itemsize

    tile_h, block_bytes = _choose_tile_h(N, H, itemsize)
    grid = (pl.cdiv(H, tile_h),)

    phys = _vmem_capacity_bytes()
    vmem_limit = int(min(int(0.75 * phys), max(32 * _MIB, 2 * block_bytes)))

    kernel = functools.partial(_norm_kernel, eps=float(eps))
    return pl.pallas_call(
        kernel,
        out_shape=jax.ShapeDtypeStruct((N, H), x.dtype),
        grid=grid,
        in_specs=[
            pl.BlockSpec((N, tile_h), lambda j: (0, j)),
            pl.BlockSpec((1, tile_h), lambda j: (0, j)),
            pl.BlockSpec((1, tile_h), lambda j: (0, j)),
        ],
        out_specs=pl.BlockSpec((N, tile_h), lambda j: (0, j)),
        compiler_params=pltpu.CompilerParams(
            dimension_semantics=("parallel",),   # shard H tiles across TCs (v7x)
            vmem_limit_bytes=vmem_limit,
        ),
    )(x, a, b)


if __name__ == "__main__":
    # Small shapes consistent with the module: batch=8, n_hidden=32.
    N, H = 8, 32
    eps = 1e-8

    key = jax.random.PRNGKey(0)
    x = jax.random.normal(key, (N, H), dtype=jnp.float32)

    # Deterministic parameter init exactly as in Norm.__init__:
    a = jnp.ones((1, H), dtype=jnp.float32)
    b = jnp.zeros((1, H), dtype=jnp.float32)

    out = jax.block_until_ready(norm_forward(x, a, b, eps=eps))

    # Pure-JAX reference (torch.std is unbiased / ddof=1).
    mean_ref = jnp.mean(x, axis=0, keepdims=True)
    std_ref = jnp.std(x, axis=0, keepdims=True, ddof=1)
    ref = (x - mean_ref) / (std_ref + eps) * a + b
    np.testing.assert_allclose(np.asarray(out), np.asarray(ref),
                               rtol=1e-5, atol=1e-5)

    print("KERNEL_OK")
</pallas_src>

<mosaic_0001>
module attributes {stable_mosaic.version = 11 : i64} {
  func.func @_norm_kernel(%arg0: i32, %arg1: memref<8x32xf32, #tpu.memory_space<vmem>>, %arg2: memref<1x32xf32, #tpu.memory_space<vmem>>, %arg3: memref<1x32xf32, #tpu.memory_space<vmem>>, %arg4: memref<8x32xf32, #tpu.memory_space<vmem>>) attributes {dimension_semantics = [#tpu.dimension_semantics<parallel>], iteration_bounds = array<i64: 1>, scalar_prefetch = 0 : i64, scratch_operands = 0 : i64, tpu.core_type = #tpu.core_type<tc>, window_params = [{transform_indices = @transform_0, window_bounds = array<i64: 8, 32>}, {transform_indices = @transform_1, window_bounds = array<i64: 1, 32>}, {transform_indices = @transform_2, window_bounds = array<i64: 1, 32>}, {transform_indices = @transform_3, window_bounds = array<i64: 8, 32>}]} {
    %c0 = arith.constant 0 : index
    %c0_0 = arith.constant 0 : index
    %0 = vector.load %arg1[%c0, %c0_0] : memref<8x32xf32, #tpu.memory_space<vmem>>, vector<8x32xf32>
    %cst = arith.constant dense<0.000000e+00> : vector<32xf32>
    %1 = vector.multi_reduction <add>, %0, %cst [0] : vector<8x32xf32> to vector<32xf32>
    %2 = vector.shape_cast %1 : vector<32xf32> to vector<1x32xf32>
    %3 = arith.mulf %0, %0 : vector<8x32xf32>
    %cst_1 = arith.constant dense<0.000000e+00> : vector<32xf32>
    %4 = vector.multi_reduction <add>, %3, %cst_1 [0] : vector<8x32xf32> to vector<32xf32>
    %5 = vector.shape_cast %4 : vector<32xf32> to vector<1x32xf32>
    %cst_2 = arith.constant 1.250000e-01 : f32
    %6 = vector.broadcast %cst_2 : f32 to vector<1x32xf32>
    %7 = arith.mulf %2, %6 : vector<1x32xf32>
    %8 = arith.mulf %2, %7 : vector<1x32xf32>
    %9 = arith.subf %5, %8 : vector<1x32xf32>
    %cst_3 = arith.constant 7.000000e+00 : f32
    %10 = vector.broadcast %cst_3 : f32 to vector<1x32xf32>
    %11 = arith.divf %9, %10 : vector<1x32xf32>
    %cst_4 = arith.constant 0.000000e+00 : f32
    %12 = vector.broadcast %cst_4 : f32 to vector<1x32xf32>
    %13 = arith.maximumf %11, %12 : vector<1x32xf32>
    %14 = math.sqrt %13 : vector<1x32xf32>
    %cst_5 = arith.constant 9.99999993E-9 : f32
    %15 = vector.broadcast %cst_5 : f32 to vector<1x32xf32>
    %16 = arith.addf %14, %15 : vector<1x32xf32>
    %17 = tpu.reciprocal %16 : vector<1x32xf32> -> vector<1x32xf32>
    %c0_6 = arith.constant 0 : index
    %c0_7 = arith.constant 0 : index
    %18 = vector.load %arg2[%c0_6, %c0_7] : memref<1x32xf32, #tpu.memory_space<vmem>>, vector<1x32xf32>
    %19 = arith.mulf %18, %17 : vector<1x32xf32>
    %c0_8 = arith.constant 0 : index
    %c0_9 = arith.constant 0 : index
    %20 = vector.load %arg3[%c0_8, %c0_9] : memref<1x32xf32, #tpu.memory_space<vmem>>, vector<1x32xf32>
    %21 = arith.mulf %7, %19 : vector<1x32xf32>
    %22 = arith.subf %20, %21 : vector<1x32xf32>
    %23 = vector.broadcast %19 : vector<1x32xf32> to vector<8x32xf32>
    %24 = arith.mulf %0, %23 : vector<8x32xf32>
    %25 = vector.broadcast %22 : vector<1x32xf32> to vector<8x32xf32>
    %26 = arith.addf %24, %25 : vector<8x32xf32>
    %c0_10 = arith.constant 0 : index
    %c0_11 = arith.constant 0 : index
    %27 = vector.load %arg4[%c0_10, %c0_11] : memref<8x32xf32, #tpu.memory_space<vmem>>, vector<8x32xf32>
    tpu.vector_store %arg4[%c0_10, %c0_11], %26 {strides = array<i32>} : memref<8x32xf32, #tpu.memory_space<vmem>>, vector<8x32xf32>,
    return
  }
  func.func @transform_0(%arg0: i32) -> (i32, i32) {
    %c0_i32 = arith.constant 0 : i32
    %c0_i32_0 = arith.constant 0 : i32
    return %c0_i32, %arg0 : i32, i32
  }
  func.func @transform_1(%arg0: i32) -> (i32, i32) {
    %c0_i32 = arith.constant 0 : i32
    %c0_i32_0 = arith.constant 0 : i32
    return %c0_i32, %arg0 : i32, i32
  }
  func.func @transform_2(%arg0: i32) -> (i32, i32) {
    %c0_i32 = arith.constant 0 : i32
    %c0_i32_0 = arith.constant 0 : i32
    return %c0_i32, %arg0 : i32, i32
  }
  func.func @transform_3(%arg0: i32) -> (i32, i32) {
    %c0_i32 = arith.constant 0 : i32
    %c0_i32_0 = arith.constant 0 : i32
    return %c0_i32, %arg0 : i32, i32
  }
}

</mosaic_0001>

<bundles_post_ra>
// kernel: tpu_custom_call.1
= control target key start
LH: loop header
LB: loop body
LE: loop exit
PB: predicated region body
PF: predicated region fallthrough
CT: control target
= control target key end

     0   :  { %8 = vsyncpa [#allocation3], 0  ;;  %s203_s0 = inlined_call_operand.hbm [shape: f32[8,32], index: 0, kind: input, shape index: {}]   ;;  %s204_s1 = inlined_call_operand.vmem [shape: f32[1,32], index: 1, kind: input, shape index: {}]   ;;  %s205_s2 = inlined_call_operand.vmem [shape: f32[1,32], index: 2, kind: input, shape index: {}]   ;;  %s206_s3 = inlined_call_operand.hbm [shape: f32[8,32], index: 3, kind: output, shape index: {}]  }
   0x1   :  { %9 = vsyncpa [#allocation4], 0  ;;  %s148_s12 = smov [#allocation2]   ;;  %s100_s16 = scalar_lea.hbm %s203_s0, 128 }
   0x2   :  { %s16_s13 = sshll.u32 %s148_s12, 4  ;;  %p101_p0 = scmp.ne.s32.totalorder %s203_s0, %s100_s16  ;;  %s17_s13 = int_to_ptr.vmem [resolvable:$true] %s16_s13 }
   0x3   :  { %p104_p1 = scmp.lt.u32.totalorder %s100_s16, %s203_s0 }
   0x5   :  { %p106_p2 = pnand %p104_p1, %p101_p0 }
   0x7   :  { %109 = shalt.err (!%p106_p2)
}
   0x8   :  { %s110_s21 = scalar_lea.vmem %s17_s13, 128  ;;  %p115_p4 = scmp.lt.s32.totalorder %s17_s13, %s17_s13 }
   0x9   :  { %p111_p3 = scmp.ne.s32.totalorder %s17_s13, %s110_s21  ;;  %p116_p5 = scmp.lt.s32.totalorder %s110_s21, %s110_s21 }
   0xb   :  { %p117_p6 = por %p116_p5, %p115_p4 }
   0xd   :  { %p118_p7 = pnand %p117_p6, %p111_p3 }
   0xf   :  { %121 = shalt.err (!%p118_p7)
}
  0x10   :  { %19 = dma.hbm_to_vmem [thread:$0]  %s203_s0, 128, %s17_s13, [#allocation3]  }
  0x11   :  { %144 = dma.done.wait [#allocation3], 128  }
  0x12   :  { %145 = vsyncadd [#allocation3], 4294967168  ;;  %vm28_vm0 = vcmask 261120   ;;  %v27_v0 = vld [vmem:[#allocation2] sm:$0xff]  ;;  %v65_v27 = vlaneseq  ;;  %s149_s27 = smov [#allocation5]  }
  0x13   :  { %v29_v1 = vsel %vm28_vm0, %v27_v0, 0.0  ;;  %v36_v2 = vmul.f32 %v27_v0, %v27_v0  ;;  %v59_v29 = vld [vmem:[%s204_s1] sm:$0x1]  ;;  %s85_s28 = sshll.u32 %s149_s27, 4  ;;  %s86_s28 = int_to_ptr.vmem [resolvable:$true] %s85_s28 }
  0x14   :  { %v30_v3 = vrot.slane %v29_v1, 4  ;;  %v66_v28 = vshrl.u32 %v65_v27, 7  ;;  %v61_v33 = vld [vmem:[%s205_s2] sm:$0x1]  ;;  %s122_s29 = scalar_lea.vmem %s86_s28, 128  ;;  %p127_p9 = scmp.lt.s32.totalorder %s86_s28, %s86_s28 }
  0x15   :  { %v37_v4 = vsel %vm28_vm0, %v36_v2, 0.0  ;;  %p123_p8 = scmp.ne.s32.totalorder %s86_s28, %s122_s29  ;;  %p128_p10 = scmp.lt.s32.totalorder %s122_s29, %s122_s29 }
  0x16   :  { %v31_v5 = vadd.f32 %v30_v3, %v29_v1  ;;  %v38_v6 = vrot.slane %v37_v4, 4  ;;  %v67_v30 = vsub.s32 0, %v66_v28 }
  0x17   :  { %p129_p11 = por %p128_p10, %p127_p9 }
  0x18   :  { %v32_v7 = vrot.slane %v31_v5, 2  ;;  %v39_v8 = vadd.f32 %v38_v6, %v37_v4 }
  0x19   :  { %p130_p12 = pnand %p129_p11, %p123_p8 }
  0x1a   :  { %v33_v9 = vadd.f32 %v32_v7, %v31_v5  ;;  %v40_v10 = vrot.slane %v39_v8, 2 }
  0x1c   :  { %v34_v11 = vrot.slane %v33_v9, 1  ;;  %v41_v12 = vadd.f32 %v40_v10, %v39_v8 }
  0x1e   :  { %v35_v13 = vadd.f32 %v34_v11, %v33_v9  ;;  %v42_v14 = vrot.slane %v41_v12, 1 }
  0x20   :  { %v43_v15 = vadd.f32 %v42_v14, %v41_v12  ;;  %v44_v16 = vmul.f32 0.125, %v35_v13 }
  0x22   :  { %v45_v17 = vmul.f32 %v44_v16, %v35_v13 }
  0x24   :  { %v46_v18 = vsub.f32 %v43_v15, %v45_v17 }
  0x26   :  { %v48_v19 = vmul.f32 0.14285715, %v46_v18 }
  0x28   :  { %v49_v20 = vmax.f32 %v48_v19, 0.0 }
  0x2a   :  { %96 = vrsqrt.f32 %v49_v20  ;;  %vm52_vm1 = vcmp.eq.f32.partialorder %v49_v20, inf  ;;  %v55_v22 = vand.u32 2147483648, %v49_v20  ;;  %vm54_vm2 = vcmp.eq.f32.partialorder %v49_v20, 0.0 }
  0x34   :  { %v97_v21 = vpop.eup %96 }
  0x35   :  { %v51_v23 = vmul.f32 %v97_v21, %v49_v20 }
  0x37   :  { %v53_v24 = vsel %vm52_vm1, %v49_v20, %v51_v23 }
  0x38   :  { %v56_v25 = vsel %vm54_vm2, %v55_v22, %v53_v24 }
  0x39   :  { %v57_v26 = vadd.f32 1e-08, %v56_v25 }
  0x3b   :  { %98 = vrcp.f32 %v57_v26 }
  0x45   :  { %v99_v31 = vpop.eup %98 }
  0x46   :  { %v60_v32 = vmul.f32 %v99_v31, %v59_v29 }
  0x48   :  { %v62_v34 = vmul.f32 %v60_v32, %v44_v16  ;;  %v68_v35 = vrot.slane %v60_v32, %v67_v30 }
  0x4a   :  { %v63_v36 = vsub.f32 %v61_v33, %v62_v34  ;;  %v70_v37 = vmul.f32 %v68_v35, %v27_v0 }
  0x4c   :  { %v75_v38 = vrot.slane %v63_v36, %v67_v30 }
  0x4e   :  { %v77_v39 = vadd.f32 %v75_v38, %v70_v37 }
  0x50   :  { %78 = vst.msk [vmem:[#allocation5] sm:$0xff] %vm28_vm0, %v77_v39 }
  0x51   :  { %133 = shalt.err (!%p130_p12)
}
  0x52   :  { %s134_s30 = scalar_lea.hbm %s206_s3, 128 }
  0x53   :  { %p135_p13 = scmp.ne.s32.totalorder %s206_s3, %s134_s30  ;;  %p138_p0 = scmp.lt.u32.totalorder %s134_s30, %s206_s3 }
  0x55   :  { %p140_p1 = pnand %p138_p0, %p135_p13 }
  0x57   :  { %143 = shalt.err (!%p140_p1)
}
  0x58   :  { %88 = dma.vmem_to_hbm [thread:$0]  %s86_s28, 128, %s206_s3, [#allocation4]  }
  0x59   :  { %146 = dma.done.wait [#allocation4], 128  }
  0x5a   :  { %147 = vsyncadd [#allocation4], 4294967168 }
  0x5b   :  { %92 = vsyncpa [#allocation3], 1 }
  0x5c   :  { %93 = vsyncpa [#allocation4], 1 }

</bundles_post_ra>
